<compile_context>
chip_gen: v5e
topology: v5e:2x2
jax: 0.10.0
libtpu: 0.0.40
codegen_flags: <defaults>
</compile_context>

<pallas_src>
import jax
import jax.numpy as jnp
from jax.experimental import pallas as pl
from jax.experimental.pallas import tpu as pltpu

# Small-but-faithful demo shapes (module defaults: input_dim=1024, rna_dim=19944;
# hidden dims 512/2048 kept as in the module). RNA_DIM is deliberately NOT a
# multiple of 128 so the cdiv+padding path (needed at rna_dim=19944) is exercised.
N_INST  = 8       # instances in the bag (softmax axis)
IN_DIM  = 128     # input_dim (scaled down from 1024)
ATT_HID = 512     # attention hidden (as in module)
DEC_HID = 2048    # decoder hidden (as in module)
RNA_DIM = 1000    # rna_dim (scaled down from 19944; not a multiple of 128)
TN      = 512     # rna_dim tile; multiple of 128 (512–1024 at full scale)


# ---------------------------------------------------------------------------
# Kernel 1: attention-MIL pooling + decoder layer 1 (Linear -> ReLU).
# Runs once (no grid); produces hid = (1, DEC_HID).
# ---------------------------------------------------------------------------
def pool_decode1_kernel(x_ref, wa1_ref, ba1_ref, wa2_ref, ba2_ref,
                        wd1_ref, bd1_ref, hid_ref):
    x = x_ref[...]                                                # (N, IN_DIM)
    # attention MLP: Linear -> Tanh
    h_a = jnp.tanh(
        jnp.dot(x, wa1_ref[...], preferred_element_type=jnp.float32)
        + ba1_ref[...])                                           # (N, ATT_HID)
    # Second attention Linear has out_features=1: do it as VPU mul + lane
    # reduce instead of a degenerate (ATT_HID, 1) MXU matmul (also avoids the
    # lane-padded (ATT_HID, 1) VMEM block). wa2 arrives reshaped to (1, ATT_HID).
    scores = (jnp.sum(h_a * wa2_ref[...], axis=-1, keepdims=True)
              + ba2_ref[0, 0])                                    # (N, 1)
    # softmax over the instance axis (dim=0)
    m = jnp.max(scores, axis=0, keepdims=True)
    e = jnp.exp(scores - m)
    w = e / jnp.sum(e, axis=0, keepdims=True)                     # (N, 1)
    # attended = sum(attn_weights * x, dim=0)
    attended = jnp.sum(w * x, axis=0, keepdims=True)              # (1, IN_DIM)
    # decoder layer 1: Linear -> ReLU
    hid_ref[...] = jnp.maximum(
        jnp.dot(attended, wd1_ref[...], preferred_element_type=jnp.float32)
        + bd1_ref[...], 0.0)                                      # (1, DEC_HID)


# ---------------------------------------------------------------------------
# Kernel 2: decoder layer 2, one rna_dim tile per grid step (HBM-bound GEMV).
# wd2 is streamed in bf16; accumulation stays f32 on the MXU.
# ---------------------------------------------------------------------------
def decode2_kernel(hid_ref, wd2_ref, bd2_ref, out_ref):
    h = hid_ref[...].astype(jnp.bfloat16)                         # (1, DEC_HID)
    out_ref[...] = (jnp.dot(h, wd2_ref[...],
                            preferred_element_type=jnp.float32)
                    + bd2_ref[...])                               # (1, TN)


def tangle_forward(x, params, *, tn=TN):
    wa1, ba1, wa2, ba2, wd1, bd1, wd2, bd2 = params
    att_hid = wa1.shape[1]
    dec_hid = wd1.shape[1]
    rna_dim = wd2.shape[1]

    # ---- call 1: attention pooling + decoder layer 1 -> hid (1, dec_hid) ----
    hid = pl.pallas_call(
        pool_decode1_kernel,
        out_shape=jax.ShapeDtypeStruct((1, dec_hid), jnp.float32),
        in_specs=[
            pl.BlockSpec(memory_space=pltpu.MemorySpace.VMEM),    # x
            pl.BlockSpec(memory_space=pltpu.MemorySpace.VMEM),    # wa1
            pl.BlockSpec(memory_space=pltpu.MemorySpace.VMEM),    # ba1
            pl.BlockSpec(memory_space=pltpu.MemorySpace.VMEM),    # wa2 (1, att_hid)
            pl.BlockSpec(memory_space=pltpu.MemorySpace.SMEM),    # ba2 (1, 1) scalar
            pl.BlockSpec(memory_space=pltpu.MemorySpace.VMEM),    # wd1
            pl.BlockSpec(memory_space=pltpu.MemorySpace.VMEM),    # bd1
        ],
        out_specs=pl.BlockSpec(memory_space=pltpu.MemorySpace.VMEM),
        compiler_params=pltpu.CompilerParams(
            vmem_limit_bytes=32 * 1024 * 1024),
    )(x, wa1, ba1, wa2.reshape(1, att_hid), ba2.reshape(1, 1), wd1, bd1)

    # ---- call 2: tiled rna_dim GEMV over wd2 (bf16 weight stream) ----
    n_tiles = pl.cdiv(rna_dim, tn)
    rna_pad = n_tiles * tn
    # TODO(synk): pre-cast / pre-pad wd2 and bd2 once at weight-load time in
    # production instead of per forward call.
    wd2_q = wd2.astype(jnp.bfloat16)
    bd2_p = bd2
    if rna_pad != rna_dim:
        wd2_q = jnp.pad(wd2_q, ((0, 0), (0, rna_pad - rna_dim)))
        bd2_p = jnp.pad(bd2, ((0, 0), (0, rna_pad - rna_dim)))

    cost = pl.CostEstimate(
        flops=2 * dec_hid * rna_pad,
        transcendentals=0,
        bytes_accessed=(wd2_q.size * 2 + bd2_p.size * 4
                        + hid.size * 4 + rna_pad * 4))

    out = pl.pallas_call(
        decode2_kernel,
        out_shape=jax.ShapeDtypeStruct((1, rna_pad), jnp.float32),
        grid_spec=pltpu.PrefetchScalarGridSpec(
            num_scalar_prefetch=0,
            grid=(n_tiles,),
            in_specs=[
                pl.BlockSpec((1, dec_hid), lambda j: (0, 0)),     # hid: fetched once
                pl.BlockSpec((dec_hid, tn), lambda j: (0, j)),    # wd2 tile (bf16)
                pl.BlockSpec((1, tn), lambda j: (0, j)),          # bd2 tile
            ],
            out_specs=pl.BlockSpec((1, tn), lambda j: (0, j)),
        ),
        compiler_params=pltpu.CompilerParams(
            dimension_semantics=("parallel",),   # independent tiles -> megacore OK
            vmem_limit_bytes=32 * 1024 * 1024),
        cost_estimate=cost,
    )(hid, wd2_q, bd2_p)

    # TODO(synk): if the workload ever has multiple bags, batch them so one wd2
    # stream serves B pooled vectors (turns this GEMV into a real GEMM).
    return out[0, :rna_dim]                                       # (rna_dim,)


# ---------------------------------------------------------------------------
# Params + references
# ---------------------------------------------------------------------------
def init_params(key):
    """PyTorch-style uniform(-1/sqrt(fan_in), 1/sqrt(fan_in)) init.
    Weights stored as (in, out) == transpose of nn.Linear.weight."""
    ks = jax.random.split(key, 8)

    def lin(kw, kb, fan_in, fan_out):
        bound = 1.0 / jnp.sqrt(fan_in)
        w = jax.random.uniform(kw, (fan_in, fan_out), jnp.float32, -bound, bound)
        b = jax.random.uniform(kb, (1, fan_out), jnp.float32, -bound, bound)
        return w, b

    wa1, ba1 = lin(ks[0], ks[1], IN_DIM, ATT_HID)
    wa2, ba2 = lin(ks[2], ks[3], ATT_HID, 1)
    wd1, bd1 = lin(ks[4], ks[5], IN_DIM, DEC_HID)
    wd2, bd2 = lin(ks[6], ks[7], DEC_HID, RNA_DIM)
    return (wa1, ba1, wa2, ba2, wd1, bd1, wd2, bd2)


def reference_forward(x, params, quantize_wd2=False):
    """Pure-JAX reference of the PyTorch module. With quantize_wd2=True it
    mirrors the kernel's bf16 weight-stream numerics for a tight check."""
    HI = jax.lax.Precision.HIGHEST
    wa1, ba1, wa2, ba2, wd1, bd1, wd2, bd2 = params
    scores = jnp.dot(jnp.tanh(jnp.dot(x, wa1, precision=HI) + ba1),
                     wa2, precision=HI) + ba2                     # (N, 1)
    w = jax.nn.softmax(scores, axis=0)
    attended = jnp.sum(w * x, axis=0, keepdims=True)              # (1, IN_DIM)
    h = jnp.maximum(jnp.dot(attended, wd1, precision=HI) + bd1, 0.0)
    if quantize_wd2:
        y = jnp.dot(h.astype(jnp.bfloat16), wd2.astype(jnp.bfloat16),
                    preferred_element_type=jnp.float32) + bd2
    else:
        y = jnp.dot(h, wd2, precision=HI) + bd2
    return y[0]                                                   # (RNA_DIM,)


if __name__ == "__main__":
    key = jax.random.PRNGKey(0)
    kx, kp = jax.random.split(key)
    x = jax.random.normal(kx, (N_INST, IN_DIM), jnp.float32)
    params = init_params(kp)

    out = jax.block_until_ready(tangle_forward(x, params))
    ref_q = reference_forward(x, params, quantize_wd2=True)   # kernel numerics
    ref_f32 = reference_forward(x, params, quantize_wd2=False)  # module semantics

    assert out.shape == (RNA_DIM,)
    assert jnp.allclose(out, ref_q, rtol=5e-3, atol=5e-3), \
        "mismatch vs bf16-weight-stream reference"
    assert jnp.allclose(out, ref_f32, rtol=5e-2, atol=2e-2), \
        "mismatch vs full-f32 module reference"
    print("KERNEL_OK")
</pallas_src>

<mosaic_0001>
module attributes {stable_mosaic.version = 11 : i64} {
  func.func @pool_decode1_kernel(%arg0: memref<8x128xf32, #tpu.memory_space<vmem>>, %arg1: memref<128x512xf32, #tpu.memory_space<vmem>>, %arg2: memref<1x512xf32, #tpu.memory_space<vmem>>, %arg3: memref<1x512xf32, #tpu.memory_space<vmem>>, %arg4: memref<1x1xf32, #tpu.memory_space<smem>>, %arg5: memref<128x2048xf32, #tpu.memory_space<vmem>>, %arg6: memref<1x2048xf32, #tpu.memory_space<vmem>>, %arg7: memref<1x2048xf32, #tpu.memory_space<vmem>>) attributes {dimension_semantics = [], scalar_prefetch = 0 : i64, scratch_operands = 0 : i64, tpu.core_type = #tpu.core_type<tc>} {
    %c0 = arith.constant 0 : index
    %c0_0 = arith.constant 0 : index
    %0 = vector.load %arg0[%c0, %c0_0] : memref<8x128xf32, #tpu.memory_space<vmem>>, vector<8x128xf32>
    %c0_1 = arith.constant 0 : index
    %c0_2 = arith.constant 0 : index
    %1 = vector.load %arg1[%c0_1, %c0_2] : memref<128x512xf32, #tpu.memory_space<vmem>>, vector<128x512xf32>
    %cst = arith.constant dense<0.000000e+00> : vector<8x512xf32>
    %2 = tpu.matmul %0, %1, %cst {dimension_numbers = #tpu.dot_dimension_numbers<[1], [0], [0], [1], [0, 0, 1, 1], [], []>} : vector<8x128xf32>, vector<128x512xf32>, vector<8x512xf32> -> vector<8x512xf32>
    %c0_3 = arith.constant 0 : index
    %c0_4 = arith.constant 0 : index
    %3 = vector.load %arg2[%c0_3, %c0_4] : memref<1x512xf32, #tpu.memory_space<vmem>>, vector<1x512xf32>
    %4 = vector.broadcast %3 : vector<1x512xf32> to vector<8x512xf32>
    %5 = arith.addf %2, %4 : vector<8x512xf32>
    %6 = math.tanh %5 : vector<8x512xf32>
    %c0_5 = arith.constant 0 : index
    %c0_6 = arith.constant 0 : index
    %7 = vector.load %arg3[%c0_5, %c0_6] : memref<1x512xf32, #tpu.memory_space<vmem>>, vector<1x512xf32>
    %8 = vector.broadcast %7 : vector<1x512xf32> to vector<8x512xf32>
    %9 = arith.mulf %6, %8 : vector<8x512xf32>
    %cst_7 = arith.constant dense<0.000000e+00> : vector<8xf32>
    %10 = vector.multi_reduction <add>, %9, %cst_7 [1] : vector<8x512xf32> to vector<8xf32>
    %11 = vector.shape_cast %10 : vector<8xf32> to vector<8x1xf32>
    %c0_8 = arith.constant 0 : index
    %c0_9 = arith.constant 0 : index
    %12 = memref.load %arg4[%c0_8, %c0_9] : memref<1x1xf32, #tpu.memory_space<smem>>
    %13 = vector.broadcast %12 : f32 to vector<8x1xf32>
    %14 = arith.addf %11, %13 : vector<8x1xf32>
    %cst_10 = arith.constant dense<0xFF800000> : vector<1xf32>
    %15 = vector.multi_reduction <maximumf>, %14, %cst_10 [0] : vector<8x1xf32> to vector<1xf32>
    %16 = vector.shape_cast %15 : vector<1xf32> to vector<1x1xf32>
    %17 = vector.broadcast %16 : vector<1x1xf32> to vector<8x1xf32>
    %18 = arith.subf %14, %17 : vector<8x1xf32>
    %19 = math.exp %18 : vector<8x1xf32>
    %cst_11 = arith.constant dense<0.000000e+00> : vector<1xf32>
    %20 = vector.multi_reduction <add>, %19, %cst_11 [0] : vector<8x1xf32> to vector<1xf32>
    %21 = vector.shape_cast %20 : vector<1xf32> to vector<1x1xf32>
    %22 = vector.broadcast %21 : vector<1x1xf32> to vector<8x1xf32>
    %23 = arith.divf %19, %22 : vector<8x1xf32>
    %24 = vector.broadcast %23 : vector<8x1xf32> to vector<8x128xf32>
    %25 = arith.mulf %24, %0 : vector<8x128xf32>
    %cst_12 = arith.constant dense<0.000000e+00> : vector<128xf32>
    %26 = vector.multi_reduction <add>, %25, %cst_12 [0] : vector<8x128xf32> to vector<128xf32>
    %27 = vector.shape_cast %26 : vector<128xf32> to vector<1x128xf32>
    %c0_13 = arith.constant 0 : index
    %c0_14 = arith.constant 0 : index
    %28 = vector.load %arg5[%c0_13, %c0_14] : memref<128x2048xf32, #tpu.memory_space<vmem>>, vector<128x2048xf32>
    %cst_15 = arith.constant dense<0.000000e+00> : vector<1x2048xf32>
    %29 = tpu.matmul %27, %28, %cst_15 {dimension_numbers = #tpu.dot_dimension_numbers<[1], [0], [0], [1], [0, 0, 1, 1], [], []>} : vector<1x128xf32>, vector<128x2048xf32>, vector<1x2048xf32> -> vector<1x2048xf32>
    %c0_16 = arith.constant 0 : index
    %c0_17 = arith.constant 0 : index
    %30 = vector.load %arg6[%c0_16, %c0_17] : memref<1x2048xf32, #tpu.memory_space<vmem>>, vector<1x2048xf32>
    %31 = arith.addf %29, %30 : vector<1x2048xf32>
    %cst_18 = arith.constant 0.000000e+00 : f32
    %32 = vector.broadcast %cst_18 : f32 to vector<1x2048xf32>
    %33 = arith.maximumf %31, %32 : vector<1x2048xf32>
    %c0_19 = arith.constant 0 : index
    %c0_20 = arith.constant 0 : index
    %34 = vector.load %arg7[%c0_19, %c0_20] : memref<1x2048xf32, #tpu.memory_space<vmem>>, vector<1x2048xf32>
    tpu.vector_store %arg7[%c0_19, %c0_20], %33 {strides = array<i32>} : memref<1x2048xf32, #tpu.memory_space<vmem>>, vector<1x2048xf32>,
    return
  }
}

</mosaic_0001>

<bundles_post_ra>
// kernel: tpu_custom_call.1
= control target key start
LH: loop header
LB: loop body
LE: loop exit
PB: predicated region body
PF: predicated region fallthrough
CT: control target
= control target key end

     0   :  { %13 = vsyncpa [#allocation4], 0  ;;  %s1317_s0 = inlined_call_operand.hbm [shape: f32[8,128], index: 0, kind: input, shape index: {}]   ;;  %s1318_s1 = inlined_call_operand.hbm [shape: f32[128,512], index: 1, kind: input, shape index: {}]   ;;  %s1319_s2 = inlined_call_operand.hbm [shape: f32[1,512], index: 2, kind: input, shape index: {}]   ;;  %s1320_s3 = inlined_call_operand.vmem [shape: f32[1,512], index: 3, kind: input, shape index: {}]   ;;  %s1321_s4 = inlined_call_operand.<no memory space> [shape: f32[1,1], index: 4, kind: input, shape index: {}]   ;;  %s1322_s5 = inlined_call_operand.hbm [shape: f32[128,2048], index: 5, kind: input, shape index: {}]   ;;  %s1323_s6 = inlined_call_operand.hbm [shape: f32[1,2048], index: 6, kind: input, shape index: {}]   ;;  %s1324_s7 = inlined_call_operand.hbm [shape: f32[1,2048], index: 7, kind: output, shape index: {}]  }
   0x1   :  { %14 = vsyncpa [#allocation7], 0 }
   0x2   :  { %15 = vsyncpa [#allocation10], 0  ;;  %s32_s26 = sshll.u32 %s1318_s1, 4  ;;  %s33_s26 = int_to_ptr.hbm [resolvable:$true] %s32_s26 }
   0x3   :  { %16 = vsyncpa [#allocation5], 0  ;;  %s1194_s27 = smov [#allocation6]   ;;  %s60_s8 = sshll.u32 %s1322_s5, 4  ;;  %s61_s8 = int_to_ptr.hbm [resolvable:$true] %s60_s8 }
   0x4   :  { %s34_s28 = sshll.u32 %s1194_s27, 4  ;;  %s1195_s9 = smov 512   ;;  %s35_s28 = int_to_ptr.vmem [resolvable:$true] %s34_s28 }
   0x5   :  { %s1196_s10 = smov 32   ;;  %s1197_s11 = smov [#allocation9]  }
   0x6   :  { %40 = dma.hbm_to_vmem [thread:$0]  %s33_s26, 8192, %s35_s28, [#allocation7], %s1195_s9, %s1195_s9, %s1196_s10  }
   0x7   :  { %s62_s12 = sshll.u32 %s1197_s11, 4  ;;  %s1198_s13 = smov 2048   ;;  %s63_s12 = int_to_ptr.vmem [resolvable:$true] %s62_s12 }
   0x8   :  { %s1199_s14 = smov 128   ;;  %s22_s16 = sshll.u32 %s1317_s0, 4  ;;  %s23_s16 = int_to_ptr.hbm [resolvable:$true] %s22_s16 }
   0x9   :  { %68 = dma.hbm_to_vmem [thread:$0]  %s61_s8, 32768, %s63_s12, [#allocation10], %s1198_s13, %s1198_s13, %s1199_s14  }
   0xa   :  { %s1200_s17 = smov [#allocation3]   ;;  %s46_s20 = sshll.u32 %s1319_s2, 4  ;;  %s47_s20 = int_to_ptr.hbm [resolvable:$true] %s46_s20 }
   0xb   :  { %s24_s18 = sshll.u32 %s1200_s17, 4  ;;  %s1201_s21 = smov [#allocation8]   ;;  %s25_s18 = int_to_ptr.vmem [resolvable:$true] %s24_s18 }
   0xc   :  { %27 = dma.hbm_to_vmem [thread:$0]  %s23_s16, 128, %s25_s18, [#allocation4]  }
   0xd   :  { %s48_s22 = sshll.u32 %s1201_s21, 4  ;;  %s74_s25 = sshll.u32 %s1323_s6, 4  ;;  %s49_s22 = int_to_ptr.vmem [resolvable:$true] %s48_s22  ;;  %s75_s25 = int_to_ptr.hbm [resolvable:$true] %s74_s25 }
   0xe   :  { %51 = dma.hbm_to_vmem [thread:$0]  %s47_s20, 64, %s49_s22, [#allocation7]  }
   0xf   :  { %s1202_s0 = smov [#allocation11]  }
  0x10   :  { %s76_s26 = sshll.u32 %s1202_s0, 4  ;;  %s77_s26 = int_to_ptr.vmem [resolvable:$true] %s76_s26 }
  0x11   :  { %79 = dma.hbm_to_vmem [thread:$0]  %s75_s25, 256, %s77_s26, [#allocation10]  }
  0x12   :  { %1186 = dma.done.wait [#allocation4], 128  }
  0x13   :  { %1187 = vsyncadd [#allocation4], 4294967168 }
  0x14   :  { %1188 = dma.done.wait [#allocation7], 8256  }
  0x15   :  { %1189 = vsyncadd [#allocation7], 4294959040 }
  0x16   :  { %1190 = dma.done.wait [#allocation10], 33024  }
  0x17   :  { %1191 = vsyncadd [#allocation10], 4294934272  ;;  %v163_v0 = vld [vmem:[#allocation6 + $0x1f0] sm:$0xff]  ;;  %v164_v2 = vld [vmem:[#allocation6 + $0x1f8] sm:$0xff]  ;;  %vm976_vm4 = vcmask 1040384   ;;  %vm978_vm5 = vcmask 1042434  }
  0x18   :  { %v159_v1 = vld [vmem:[#allocation6 + $0x1d0] sm:$0xff]  ;;  %215 = vmatpush.msra.mxu2 %v163_v0  ;;  %235 = vmatpush.msra.mxu3 %v164_v2  ;;  %v161_v3 = vld [vmem:[#allocation6 + $0x1e0] sm:$0xff]  ;;  %v162_v4 = vld [vmem:[#allocation6 + $0x1e8] sm:$0xff]  ;;  %vm980_vm6 = vcmask 1041408   ;;  %vm982_vm7 = vcmask 1044484   ;;  %vm984_vm8 = vcmask 1046534  }
  0x19   :  { %v155_v5 = vld [vmem:[#allocation6 + $0x1b0] sm:$0xff]  ;;  %175 = vmatpush.msra.mxu0 %v161_v3  ;;  %195 = vmatpush.msra.mxu1 %v162_v4  ;;  %v160_v6 = vld [vmem:[#allocation6 + $0x1d8] sm:$0xff]  ;;  %v157_v7 = vld [vmem:[#allocation6 + $0x1c0] sm:$0xff]  ;;  %vm986_vm9 = vcmask 1045508   ;;  %vm988_vm10 = vcmask 1043456   ;;  %s1008_s8 = sshll.u32 %s1324_s7, 4  ;;  %s1009_s8 = int_to_ptr.hbm [resolvable:$true] %s1008_s8 }
  0x1a   :  { %v158_v8 = vld [vmem:[#allocation6 + $0x1c8] sm:$0xff]  ;;  %216 = vmatpush.msra.mxu2 %v159_v1  ;;  %236 = vmatpush.msra.mxu3 %v160_v6  ;;  %v156_v9 = vld [vmem:[#allocation6 + $0x1b8] sm:$0xff]  ;;  %v153_v10 = vld [vmem:[#allocation6 + $0x1a0] sm:$0xff] }
  0x1b   :  { %176 = vmatpush.msra.mxu0 %v157_v7  ;;  %196 = vmatpush.msra.mxu1 %v158_v8  ;;  %v151_v11 = vld [vmem:[#allocation6 + $0x190] sm:$0xff]  ;;  %v154_v12 = vld [vmem:[#allocation6 + $0x1a8] sm:$0xff]  ;;  %v152_v13 = vld [vmem:[#allocation6 + $0x198] sm:$0xff] }
  0x1c   :  { %217 = vmatpush.msra.mxu2 %v155_v5  ;;  %237 = vmatpush.msra.mxu3 %v156_v9  ;;  %v149_v14 = vld [vmem:[#allocation6 + $0x180] sm:$0xff]  ;;  %v150_v15 = vld [vmem:[#allocation6 + $0x188] sm:$0xff]  ;;  %v147_v16 = vld [vmem:[#allocation6 + $0x170] sm:$0xff] }
  0x1d   :  { %177 = vmatpush.msra.mxu0 %v153_v10  ;;  %197 = vmatpush.msra.mxu1 %v154_v12  ;;  %v148_v17 = vld [vmem:[#allocation6 + $0x178] sm:$0xff]  ;;  %v145_v18 = vld [vmem:[#allocation6 + $0x160] sm:$0xff]  ;;  %v146_v19 = vld [vmem:[#allocation6 + $0x168] sm:$0xff] }
  0x1e   :  { %218 = vmatpush.msra.mxu2 %v151_v11  ;;  %238 = vmatpush.msra.mxu3 %v152_v13  ;;  %v143_v20 = vld [vmem:[#allocation6 + $0x150] sm:$0xff]  ;;  %v144_v21 = vld [vmem:[#allocation6 + $0x158] sm:$0xff]  ;;  %v141_v22 = vld [vmem:[#allocation6 + $0x140] sm:$0xff] }
  0x1f   :  { %178 = vmatpush.msra.mxu0 %v149_v14  ;;  %198 = vmatpush.msra.mxu1 %v150_v15  ;;  %v142_v23 = vld [vmem:[#allocation6 + $0x148] sm:$0xff]  ;;  %v139_v24 = vld [vmem:[#allocation6 + $0x130] sm:$0xff]  ;;  %v140_v25 = vld [vmem:[#allocation6 + $0x138] sm:$0xff] }
  0x20   :  { %219 = vmatpush.msra.mxu2 %v147_v16  ;;  %239 = vmatpush.msra.mxu3 %v148_v17  ;;  %v137_v26 = vld [vmem:[#allocation6 + $0x120] sm:$0xff]  ;;  %v138_v27 = vld [vmem:[#allocation6 + $0x128] sm:$0xff]  ;;  %v135_v28 = vld [vmem:[#allocation6 + $0x110] sm:$0xff] }
  0x21   :  { %179 = vmatpush.msra.mxu0 %v145_v18  ;;  %199 = vmatpush.msra.mxu1 %v146_v19  ;;  %v136_v29 = vld [vmem:[#allocation6 + $0x118] sm:$0xff]  ;;  %v133_v30 = vld [vmem:[#allocation6 + $0x100] sm:$0xff]  ;;  %v134_v31 = vld [vmem:[#allocation6 + $0x108] sm:$0xff] }
  0x22   :  { %220 = vmatpush.msra.mxu2 %v143_v20  ;;  %240 = vmatpush.msra.mxu3 %v144_v21  ;;  %v131_v32 = vld [vmem:[#allocation6 + $0xf0] sm:$0xff]  ;;  %v132_v33 = vld [vmem:[#allocation6 + $0xf8] sm:$0xff]  ;;  %v129_v34 = vld [vmem:[#allocation6 + $0xe0] sm:$0xff] }
  0x23   :  { %180 = vmatpush.msra.mxu0 %v141_v22  ;;  %200 = vmatpush.msra.mxu1 %v142_v23  ;;  %v130_v35 = vld [vmem:[#allocation6 + $0xe8] sm:$0xff]  ;;  %v127_v36 = vld [vmem:[#allocation6 + $0xd0] sm:$0xff]  ;;  %v128_v37 = vld [vmem:[#allocation6 + $0xd8] sm:$0xff] }
  0x24   :  { %221 = vmatpush.msra.mxu2 %v139_v24  ;;  %241 = vmatpush.msra.mxu3 %v140_v25  ;;  %v125_v38 = vld [vmem:[#allocation6 + $0xc0] sm:$0xff]  ;;  %v126_v39 = vld [vmem:[#allocation6 + $0xc8] sm:$0xff]  ;;  %v123_v40 = vld [vmem:[#allocation6 + $0xb0] sm:$0xff] }
  0x25   :  { %181 = vmatpush.msra.mxu0 %v137_v26  ;;  %201 = vmatpush.msra.mxu1 %v138_v27  ;;  %v124_v41 = vld [vmem:[#allocation6 + $0xb8] sm:$0xff]  ;;  %v121_v42 = vld [vmem:[#allocation6 + $0xa0] sm:$0xff]  ;;  %v122_v43 = vld [vmem:[#allocation6 + $0xa8] sm:$0xff] }
  0x26   :  { %222 = vmatpush.msra.mxu2 %v135_v28  ;;  %242 = vmatpush.msra.mxu3 %v136_v29  ;;  %v119_v44 = vld [vmem:[#allocation6 + $0x90] sm:$0xff]  ;;  %v120_v45 = vld [vmem:[#allocation6 + $0x98] sm:$0xff]  ;;  %v117_v46 = vld [vmem:[#allocation6 + $0x80] sm:$0xff] }
  0x27   :  { %182 = vmatpush.msra.mxu0 %v133_v30  ;;  %202 = vmatpush.msra.mxu1 %v134_v31  ;;  %v118_v47 = vld [vmem:[#allocation6 + $0x88] sm:$0xff]  ;;  %v115_v48 = vld [vmem:[#allocation6 + $0x70] sm:$0xff]  ;;  %v116_v49 = vld [vmem:[#allocation6 + $0x78] sm:$0xff] }
  0x28   :  { %223 = vmatpush.msra.mxu2 %v131_v32  ;;  %243 = vmatpush.msra.mxu3 %v132_v33  ;;  %v113_v50 = vld [vmem:[#allocation6 + $0x60] sm:$0xff]  ;;  %v114_v51 = vld [vmem:[#allocation6 + $0x68] sm:$0xff]  ;;  %v111_v52 = vld [vmem:[#allocation6 + $0x50] sm:$0xff] }
  0x29   :  { %183 = vmatpush.msra.mxu0 %v129_v34  ;;  %203 = vmatpush.msra.mxu1 %v130_v35  ;;  %v112_v53 = vld [vmem:[#allocation6 + $0x58] sm:$0xff]  ;;  %v109_v54 = vld [vmem:[#allocation6 + $0x40] sm:$0xff]  ;;  %v110_v55 = vld [vmem:[#allocation6 + $0x48] sm:$0xff] }
  0x2a   :  { %224 = vmatpush.msra.mxu2 %v127_v36  ;;  %244 = vmatpush.msra.mxu3 %v128_v37  ;;  %v107_v56 = vld [vmem:[#allocation6 + $0x30] sm:$0xff]  ;;  %v108_v57 = vld [vmem:[#allocation6 + $0x38] sm:$0xff]  ;;  %v105_v58 = vld [vmem:[#allocation6 + $0x20] sm:$0xff] }
  0x2b   :  { %184 = vmatpush.msra.mxu0 %v125_v38  ;;  %204 = vmatpush.msra.mxu1 %v126_v39  ;;  %v106_v59 = vld [vmem:[#allocation6 + $0x28] sm:$0xff]  ;;  %v103_v60 = vld [vmem:[#allocation6 + $0x10] sm:$0xff]  ;;  %v104_v61 = vld [vmem:[#allocation6 + $0x18] sm:$0xff] }
  0x2c   :  { %225 = vmatpush.msra.mxu2 %v123_v40  ;;  %245 = vmatpush.msra.mxu3 %v124_v41  ;;  %v1259_v62 = vld [vmem:[#allocation3] sm:$0xff]  ;;  %v101_v63 = vld [vmem:[#allocation6] sm:$0xff]  ;;  %v102_v0 = vld [vmem:[#allocation6 + $0x8] sm:$0xff] }
  0x2d   :  { %185 = vmatpush.msra.mxu0 %v121_v42  ;;  %205 = vmatpush.msra.mxu1 %v122_v43  ;;  %v165_v1 = vld [vmem:[#allocation8] sm:$0xf]  ;;  %v259_v10 = vld [vmem:[%s1320_s3] sm:$0xf]  ;;  %v558_v30 = vld [vmem:[#allocation9 + $0x780] sm:$0xff] }
  0x2e   :  { %226 = vmatpush.msra.mxu2 %v119_v44  ;;  %246 = vmatpush.msra.mxu3 %v120_v45  ;;  %v167_v2 = vperm.slane %v165_v1, 0  ;;  %v168_v3 = vperm.slane %v165_v1, 1  ;;  %v169_v8 = vperm.slane %v165_v1, 2  ;;  %v170_v9 = vperm.slane %v165_v1, 3  ;;  %v559_v31 = vld [vmem:[#allocation9 + $0x788] sm:$0xff]  ;;  %v560_v32 = vld [vmem:[#allocation9 + $0x790] sm:$0xff] }
  0x2f   :  { %186 = vmatpush.msra.mxu0 %v117_v46  ;;  %206 = vmatpush.msra.mxu1 %v118_v47  ;;  %v261_v15 = vperm.slane %v259_v10, 0  ;;  %v262_v16 = vperm.slane %v259_v10, 1  ;;  %v263_v19 = vperm.slane %v259_v10, 2  ;;  %v264_v21 = vperm.slane %v259_v10, 3  ;;  %v561_v33 = vld [vmem:[#allocation9 + $0x798] sm:$0xff]  ;;  %v542_v34 = vld [vmem:[#allocation9 + $0x700] sm:$0xff] }
  0x30   :  { %227 = vmatpush.msra.mxu2 %v115_v48  ;;  %247 = vmatpush.msra.mxu3 %v116_v49  ;;  %v543_v35 = vld [vmem:[#allocation9 + $0x708] sm:$0xff]  ;;  %v544_v36 = vld [vmem:[#allocation9 + $0x710] sm:$0xff]  ;;  %v545_v37 = vld [vmem:[#allocation9 + $0x718] sm:$0xff] }
  0x31   :  { %187 = vmatpush.msra.mxu0 %v113_v50  ;;  %207 = vmatpush.msra.mxu1 %v114_v51  ;;  %v526_v38 = vld [vmem:[#allocation9 + $0x680] sm:$0xff]  ;;  %v527_v39 = vld [vmem:[#allocation9 + $0x688] sm:$0xff]  ;;  %v528_v40 = vld [vmem:[#allocation9 + $0x690] sm:$0xff] }
  0x32   :  { %228 = vmatpush.msra.mxu2 %v111_v52  ;;  %248 = vmatpush.msra.mxu3 %v112_v53  ;;  %v529_v41 = vld [vmem:[#allocation9 + $0x698] sm:$0xff]  ;;  %v510_v42 = vld [vmem:[#allocation9 + $0x600] sm:$0xff]  ;;  %v511_v43 = vld [vmem:[#allocation9 + $0x608] sm:$0xff] }
  0x33   :  { %188 = vmatpush.msra.mxu0 %v109_v54  ;;  %208 = vmatpush.msra.mxu1 %v110_v55  ;;  %v512_v44 = vld [vmem:[#allocation9 + $0x610] sm:$0xff]  ;;  %v513_v45 = vld [vmem:[#allocation9 + $0x618] sm:$0xff]  ;;  %v494_v46 = vld [vmem:[#allocation9 + $0x580] sm:$0xff] }
  0x34   :  { %229 = vmatpush.msra.mxu2 %v107_v56  ;;  %249 = vmatpush.msra.mxu3 %v108_v57  ;;  %v495_v47 = vld [vmem:[#allocation9 + $0x588] sm:$0xff]  ;;  %v496_v48 = vld [vmem:[#allocation9 + $0x590] sm:$0xff]  ;;  %v497_v49 = vld [vmem:[#allocation9 + $0x598] sm:$0xff] }
  0x35   :  { %189 = vmatpush.msra.mxu0 %v105_v58  ;;  %209 = vmatpush.msra.mxu1 %v106_v59  ;;  %v478_v50 = vld [vmem:[#allocation9 + $0x500] sm:$0xff]  ;;  %v479_v51 = vld [vmem:[#allocation9 + $0x508] sm:$0xff]  ;;  %v480_v52 = vld [vmem:[#allocation9 + $0x510] sm:$0xff] }
  0x36   :  { %230 = vmatpush.msra.mxu2 %v103_v60  ;;  %250 = vmatpush.msra.mxu3 %v104_v61  ;;  %v481_v53 = vld [vmem:[#allocation9 + $0x518] sm:$0xff]  ;;  %v462_v54 = vld [vmem:[#allocation9 + $0x480] sm:$0xff]  ;;  %v463_v55 = vld [vmem:[#allocation9 + $0x488] sm:$0xff] }
  0x37   :  { %231 = vmatmul.f32.vlgmr.msra.gmra.mxu2 %v1259_v62  ;;  %251 = vmatmul.f32.vlgmr.msra.gmra.mxu3 %v1259_v62  ;;  %v464_v56 = vld [vmem:[#allocation9 + $0x490] sm:$0xff]  ;;  %v465_v57 = vld [vmem:[#allocation9 + $0x498] sm:$0xff]  ;;  %v446_v58 = vld [vmem:[#allocation9 + $0x400] sm:$0xff] }
  0x38   :  { %190 = vmatpush.msra.mxu0 %v101_v63  ;;  %210 = vmatpush.msra.mxu1 %v102_v0  ;;  %v447_v59 = vld [vmem:[#allocation9 + $0x408] sm:$0xff]  ;;  %v448_v60 = vld [vmem:[#allocation9 + $0x410] sm:$0xff]  ;;  %v449_v61 = vld [vmem:[#allocation9 + $0x418] sm:$0xff] }
  0x39   :  { %191 = vmatmul.f32.vlgmr.msra.gmra.mxu0 %v1259_v62  ;;  %211 = vmatmul.f32.vlgmr.msra.gmra.mxu1 %v1259_v62  ;;  %v430_v63 = vld [vmem:[#allocation9 + $0x380] sm:$0xff]  ;;  %v431_v0 = vld [vmem:[#allocation9 + $0x388] sm:$0xff]  ;;  %v432_v1 = vld [vmem:[#allocation9 + $0x390] sm:$0xff] }
  0x3a   :  { %610 = vmatpush.msrb.mxu0 %v558_v30  ;;  %630 = vmatpush.msrb.mxu1 %v559_v31  ;;  %v401_v10 = vld [vmem:[#allocation9 + $0x298] sm:$0xff] }
  0x3b   :  { %650 = vmatpush.msrb.mxu2 %v560_v32  ;;  %670 = vmatpush.msrb.mxu3 %v561_v33  ;;  %v337_v31 = vld [vmem:[#allocation9 + $0x98] sm:$0xff]  ;;  %v318_v32 = vld [vmem:[#allocation9] sm:$0xff]  ;;  %v319_v33 = vld [vmem:[#allocation9 + $0x8] sm:$0xff] }
  0x3c   :  { %611 = vmatpush.msrb.mxu0 %v542_v34  ;;  %631 = vmatpush.msrb.mxu1 %v543_v35  ;;  %v320_v34 = vld [vmem:[#allocation9 + $0x10] sm:$0xff] }
  0x3d   :  { %651 = vmatpush.msrb.mxu2 %v544_v36  ;;  %671 = vmatpush.msrb.mxu3 %v545_v37  ;;  %v321_v36 = vld [vmem:[#allocation9 + $0x18] sm:$0xff]  ;;  %v562_v37 = vld [vmem:[#allocation9 + $0x7a0] sm:$0xff] }
  0x3e   :  { %612 = vmatpush.msrb.mxu0 %v526_v38  ;;  %632 = vmatpush.msrb.mxu1 %v527_v39  ;;  %v563_v38 = vld [vmem:[#allocation9 + $0x7a8] sm:$0xff]  ;;  %v564_v39 = vld [vmem:[#allocation9 + $0x7b0] sm:$0xff] }
  0x3f   :  { %652 = vmatpush.msrb.mxu2 %v528_v40  ;;  %672 = vmatpush.msrb.mxu3 %v529_v41  ;;  %v565_v40 = vld [vmem:[#allocation9 + $0x7b8] sm:$0xff] }
  0x40   :  { %613 = vmatpush.msrb.mxu0 %v510_v42  ;;  %633 = vmatpush.msrb.mxu1 %v511_v43  ;;  %v546_v42 = vld [vmem:[#allocation9 + $0x720] sm:$0xff]  ;;  %v547_v43 = vld [vmem:[#allocation9 + $0x728] sm:$0xff] }
  0x41   :  { %653 = vmatpush.msrb.mxu2 %v512_v44  ;;  %673 = vmatpush.msrb.mxu3 %v513_v45  ;;  %v548_v44 = vld [vmem:[#allocation9 + $0x730] sm:$0xff]  ;;  %v549_v45 = vld [vmem:[#allocation9 + $0x738] sm:$0xff] }
  0x42   :  { %614 = vmatpush.msrb.mxu0 %v494_v46  ;;  %634 = vmatpush.msrb.mxu1 %v495_v47  ;;  %v530_v47 = vld [vmem:[#allocation9 + $0x6a0] sm:$0xff] }
  0x43   :  { %654 = vmatpush.msrb.mxu2 %v496_v48  ;;  %674 = vmatpush.msrb.mxu3 %v497_v49  ;;  %v531_v48 = vld [vmem:[#allocation9 + $0x6a8] sm:$0xff]  ;;  %v532_v49 = vld [vmem:[#allocation9 + $0x6b0] sm:$0xff] }
  0x44   :  { %615 = vmatpush.msrb.mxu0 %v478_v50  ;;  %635 = vmatpush.msrb.mxu1 %v479_v51  ;;  %v533_v50 = vld [vmem:[#allocation9 + $0x6b8] sm:$0xff] }
  0x45   :  { %655 = vmatpush.msrb.mxu2 %v480_v52  ;;  %675 = vmatpush.msrb.mxu3 %v481_v53  ;;  %v514_v52 = vld [vmem:[#allocation9 + $0x620] sm:$0xff]  ;;  %v515_v53 = vld [vmem:[#allocation9 + $0x628] sm:$0xff] }
  0x46   :  { %616 = vmatpush.msrb.mxu0 %v462_v54  ;;  %636 = vmatpush.msrb.mxu1 %v463_v55  ;;  %v516_v54 = vld [vmem:[#allocation9 + $0x630] sm:$0xff]  ;;  %v517_v55 = vld [vmem:[#allocation9 + $0x638] sm:$0xff] }
  0x47   :  { %656 = vmatpush.msrb.mxu2 %v464_v56  ;;  %676 = vmatpush.msrb.mxu3 %v465_v57  ;;  %v498_v57 = vld [vmem:[#allocation9 + $0x5a0] sm:$0xff] }
  0x48   :  { %617 = vmatpush.msrb.mxu0 %v446_v58  ;;  %637 = vmatpush.msrb.mxu1 %v447_v59  ;;  %v499_v58 = vld [vmem:[#allocation9 + $0x5a8] sm:$0xff]  ;;  %v500_v59 = vld [vmem:[#allocation9 + $0x5b0] sm:$0xff] }
  0x49   :  { %657 = vmatpush.msrb.mxu2 %v448_v60  ;;  %677 = vmatpush.msrb.mxu3 %v449_v61  ;;  %v501_v60 = vld [vmem:[#allocation9 + $0x5b8] sm:$0xff] }
  0x4a   :  { %618 = vmatpush.msrb.mxu0 %v430_v63  ;;  %638 = vmatpush.msrb.mxu1 %v431_v0  ;;  %v482_v63 = vld [vmem:[#allocation9 + $0x520] sm:$0xff]  ;;  %v483_v0 = vld [vmem:[#allocation9 + $0x528] sm:$0xff] }
  0x4b   :  { %658 = vmatpush.msrb.mxu2 %v432_v1  ;;  %v484_v1 = vld [vmem:[#allocation9 + $0x530] sm:$0xff] }
  0xb6   :  { %v192_v4 = vpop.f32.mrf.mxu0  ;;  %v212_v5 = vpop.f32.mrf.mxu1 }
  0xb7   :  { %v193_v6 = vadd.f32 %v192_v4, %v167_v2  ;;  %v213_v7 = vadd.f32 %v212_v5, %v168_v3  ;;  %v433_v2 = vld [vmem:[#allocation9 + $0x398] sm:$0xff]  ;;  %v414_v3 = vld [vmem:[#allocation9 + $0x300] sm:$0xff]  ;;  %v415_v4 = vld [vmem:[#allocation9 + $0x308] sm:$0xff] }
  0xb8   :  { %678 = vmatpush.msrb.mxu3 %v433_v2  ;;  %v416_v5 = vld [vmem:[#allocation9 + $0x310] sm:$0xff]  ;;  %619 = vmatpush.msrb.mxu0 %v414_v3  ;;  %v485_v2 = vld [vmem:[#allocation9 + $0x538] sm:$0xff]  ;;  %v466_v3 = vld [vmem:[#allocation9 + $0x4a0] sm:$0xff] }
  0xb9   :  { %1030 = vtanh.f32 %v193_v6  ;;  %639 = vmatpush.msrb.mxu1 %v415_v4  ;;  %v417_v6 = vld [vmem:[#allocation9 + $0x318] sm:$0xff]  ;;  %659 = vmatpush.msrb.mxu2 %v416_v5  ;;  %v467_v4 = vld [vmem:[#allocation9 + $0x4a8] sm:$0xff]  ;;  %v468_v5 = vld [vmem:[#allocation9 + $0x4b0] sm:$0xff] }
  0xba   :  { %1032 = vtanh.f32 %v213_v7  ;;  %v232_v11 = vpop.f32.mrf.mxu2  ;;  %v252_v12 = vpop.f32.mrf.mxu3  ;;  %679 = vmatpush.msrb.mxu3 %v417_v6  ;;  %v398_v7 = vld [vmem:[#allocation9 + $0x280] sm:$0xff]  ;;  %v469_v6 = vld [vmem:[#allocation9 + $0x4b8] sm:$0xff] }
  0xbb   :  { %v233_v13 = vadd.f32 %v232_v11, %v169_v8  ;;  %v253_v14 = vadd.f32 %v252_v12, %v170_v9  ;;  %v399_v8 = vld [vmem:[#allocation9 + $0x288] sm:$0xff]  ;;  %v400_v9 = vld [vmem:[#allocation9 + $0x290] sm:$0xff]  ;;  %620 = vmatpush.msrb.mxu0 %v398_v7  ;;  %v279_v11 = vstv %s1321_s4  ;;  %v382_v12 = vld [vmem:[#allocation9 + $0x200] sm:$0xff]  ;;  %s1203_s4 = smov [#allocation12]  }
  0xbc   :  { %640 = vmatpush.msrb.mxu1 %v399_v8  ;;  %660 = vmatpush.msrb.mxu2 %v400_v9  ;;  %v450_v7 = vld [vmem:[#allocation9 + $0x420] sm:$0xff]  ;;  %v451_v8 = vld [vmem:[#allocation9 + $0x428] sm:$0xff]  ;;  %v452_v9 = vld [vmem:[#allocation9 + $0x430] sm:$0xff]  ;;  %s1006_s28 = sshll.u32 %s1203_s4, 4  ;;  %s1007_s28 = int_to_ptr.vmem [resolvable:$true] %s1006_s28 }
  0xbd   :  { %1034 = vtanh.f32 %v233_v13  ;;  %680 = vmatpush.msrb.mxu3 %v401_v10  ;;  %v383_v13 = vld [vmem:[#allocation9 + $0x208] sm:$0xff]  ;;  %621 = vmatpush.msrb.mxu0 %v382_v12  ;;  %v453_v10 = vld [vmem:[#allocation9 + $0x438] sm:$0xff] }
  0xbe   :  { %1036 = vtanh.f32 %v253_v14  ;;  %v384_v14 = vld [vmem:[#allocation9 + $0x210] sm:$0xff]  ;;  %641 = vmatpush.msrb.mxu1 %v383_v13  ;;  %v435_v12 = vld [vmem:[#allocation9 + $0x3a8] sm:$0xff] }
  0xbf   :  { %v1031_v17 = vpop.eup %1030  ;;  %661 = vmatpush.msrb.mxu2 %v384_v14  ;;  %v436_v13 = vld [vmem:[#allocation9 + $0x3b0] sm:$0xff]  ;;  %v437_v14 = vld [vmem:[#allocation9 + $0x3b8] sm:$0xff] }
  0xc0   :  { %v1033_v18 = vpop.eup %1032  ;;  %v269_v20 = vmul.f32 %v1031_v17, %v261_v15  ;;  %v385_v15 = vld [vmem:[#allocation9 + $0x218] sm:$0xff]  ;;  %v366_v17 = vld [vmem:[#allocation9 + $0x180] sm:$0xff] }
  0xc1   :  { %v270_v22 = vmul.f32 %v1033_v18, %v262_v16  ;;  %681 = vmatpush.msrb.mxu3 %v385_v15  ;;  %v367_v18 = vld [vmem:[#allocation9 + $0x188] sm:$0xff]  ;;  %622 = vmatpush.msrb.mxu0 %v366_v17 }
  0xc2   :  { %642 = vmatpush.msrb.mxu1 %v367_v18  ;;  %v419_v17 = vld [vmem:[#allocation9 + $0x328] sm:$0xff]  ;;  %v420_v18 = vld [vmem:[#allocation9 + $0x330] sm:$0xff] }
  0xc3   :  { %v1035_v23 = vpop.eup %1034  ;;  %v273_v24 = vadd.f32 %v270_v22, %v269_v20  ;;  %v350_v22 = vld [vmem:[#allocation9 + $0x100] sm:$0xff] }
  0xc4   :  { %v1037_v25 = vpop.eup %1036  ;;  %v271_v26 = vmul.f32 %v1035_v23, %v263_v19  ;;  %v368_v19 = vld [vmem:[#allocation9 + $0x190] sm:$0xff]  ;;  %v351_v23 = vld [vmem:[#allocation9 + $0x108] sm:$0xff]  ;;  %623 = vmatpush.msrb.mxu0 %v350_v22 }
  0xc5   :  { %v272_v27 = vmul.f32 %v1037_v25, %v264_v21  ;;  %v369_v21 = vld [vmem:[#allocation9 + $0x198] sm:$0xff]  ;;  %662 = vmatpush.msrb.mxu2 %v368_v19  ;;  %643 = vmatpush.msrb.mxu1 %v351_v23  ;;  %v403_v22 = vld [vmem:[#allocation9 + $0x2a8] sm:$0xff]  ;;  %v404_v23 = vld [vmem:[#allocation9 + $0x2b0] sm:$0xff] }
  0xc6   :  { %v274_v28 = vadd.f32 %v273_v24, %v271_v26  ;;  %682 = vmatpush.msrb.mxu3 %v369_v21  ;;  %v352_v24 = vld [vmem:[#allocation9 + $0x110] sm:$0xff]  ;;  %v353_v26 = vld [vmem:[#allocation9 + $0x118] sm:$0xff]  ;;  %v402_v21 = vld [vmem:[#allocation9 + $0x2a0] sm:$0xff] }
  0xc7   :  { %663 = vmatpush.msrb.mxu2 %v352_v24 }
  0xc8   :  { %v275_v29 = vadd.f32 %v274_v28, %v272_v27  ;;  %683 = vmatpush.msrb.mxu3 %v353_v26  ;;  %v334_v27 = vld [vmem:[#allocation9 + $0x80] sm:$0xff]  ;;  %v335_v28 = vld [vmem:[#allocation9 + $0x88] sm:$0xff] }
  0xc9   :  { %624 = vmatpush.msrb.mxu0 %v334_v27  ;;  %644 = vmatpush.msrb.mxu1 %v335_v28  ;;  %v386_v26 = vld [vmem:[#allocation9 + $0x220] sm:$0xff]  ;;  %v387_v27 = vld [vmem:[#allocation9 + $0x228] sm:$0xff]  ;;  %v388_v28 = vld [vmem:[#allocation9 + $0x230] sm:$0xff] }
  0xca   :  { %276 = vadd.xlane.f32.xlu0 %v275_v29  ;;  %v336_v29 = vld [vmem:[#allocation9 + $0x90] sm:$0xff]  ;;  %684 = vmatpush.msrb.mxu3 %v337_v31  ;;  %v370_v31 = vld [vmem:[#allocation9 + $0x1a0] sm:$0xff] }
  0xcb   :  { %664 = vmatpush.msrb.mxu2 %v336_v29  ;;  %625 = vmatpush.msrb.mxu0 %v318_v32  ;;  %v371_v32 = vld [vmem:[#allocation9 + $0x1a8] sm:$0xff] }
  0xcc   :  { %645 = vmatpush.msrb.mxu1 %v319_v33  ;;  %685 = vmatpush.msrb.mxu3 %v321_v36  ;;  %v372_v33 = vld [vmem:[#allocation9 + $0x1b0] sm:$0xff]  ;;  %v354_v36 = vld [vmem:[#allocation9 + $0x120] sm:$0xff] }
  0xcd   :  { %665 = vmatpush.msrb.mxu2 %v320_v34  ;;  %690 = vmatpush.msra.mxu0 %v562_v37  ;;  %v355_v37 = vld [vmem:[#allocation9 + $0x128] sm:$0xff] }
  0xce   :  { %710 = vmatpush.msra.mxu1 %v563_v38  ;;  %750 = vmatpush.msra.mxu3 %v565_v40  ;;  %v356_v38 = vld [vmem:[#allocation9 + $0x130] sm:$0xff]  ;;  %v357_v40 = vld [vmem:[#allocation9 + $0x138] sm:$0xff] }
  0xcf   :  { %730 = vmatpush.msra.mxu2 %v564_v39  ;;  %691 = vmatpush.msra.mxu0 %v546_v42  ;;  %v339_v42 = vld [vmem:[#allocation9 + $0xa8] sm:$0xff] }
  0xd0   :  { %711 = vmatpush.msra.mxu1 %v547_v43  ;;  %751 = vmatpush.msra.mxu3 %v549_v45  ;;  %v340_v43 = vld [vmem:[#allocation9 + $0xb0] sm:$0xff]  ;;  %v341_v45 = vld [vmem:[#allocation9 + $0xb8] sm:$0xff] }
  0xd1   :  { %731 = vmatpush.msra.mxu2 %v548_v44  ;;  %692 = vmatpush.msra.mxu0 %v530_v47  ;;  %v323_v47 = vld [vmem:[#allocation9 + $0x28] sm:$0xff] }
  0xd2   :  { %712 = vmatpush.msra.mxu1 %v531_v48  ;;  %752 = vmatpush.msra.mxu3 %v533_v50  ;;  %v324_v48 = vld [vmem:[#allocation9 + $0x30] sm:$0xff] }
  0xd3   :  { %732 = vmatpush.msra.mxu2 %v532_v49  ;;  %693 = vmatpush.msra.mxu0 %v514_v52  ;;  %v325_v49 = vld [vmem:[#allocation9 + $0x38] sm:$0xff] }
  0xd4   :  { %713 = vmatpush.msra.mxu1 %v515_v53  ;;  %753 = vmatpush.msra.mxu3 %v517_v55 }
  0xd5   :  { %733 = vmatpush.msra.mxu2 %v516_v54  ;;  %694 = vmatpush.msra.mxu0 %v498_v57 }
  0xd6   :  { %714 = vmatpush.msra.mxu1 %v499_v58  ;;  %754 = vmatpush.msra.mxu3 %v501_v60 }
  0xd7   :  { %734 = vmatpush.msra.mxu2 %v500_v59  ;;  %695 = vmatpush.msra.mxu0 %v482_v63 }
  0xd8   :  { %715 = vmatpush.msra.mxu1 %v483_v0  ;;  %755 = vmatpush.msra.mxu3 %v485_v2 }
  0xd9   :  { %735 = vmatpush.msra.mxu2 %v484_v1  ;;  %696 = vmatpush.msra.mxu0 %v466_v3 }
  0xda   :  { %716 = vmatpush.msra.mxu1 %v467_v4  ;;  %756 = vmatpush.msra.mxu3 %v469_v6  ;;  %v567_v6 = vld [vmem:[#allocation9 + $0x7c8] sm:$0xff] }
  0xdb   :  { %736 = vmatpush.msra.mxu2 %v468_v5  ;;  %697 = vmatpush.msra.mxu0 %v450_v7  ;;  %v566_v5 = vld [vmem:[#allocation9 + $0x7c0] sm:$0xff]  ;;  %v568_v7 = vld [vmem:[#allocation9 + $0x7d0] sm:$0xff] }
  0xdc   :  { %717 = vmatpush.msra.mxu1 %v451_v8  ;;  %757 = vmatpush.msra.mxu3 %v453_v10  ;;  %v569_v8 = vld [vmem:[#allocation9 + $0x7d8] sm:$0xff]  ;;  %v552_v10 = vld [vmem:[#allocation9 + $0x750] sm:$0xff] }
  0xdd   :  { %737 = vmatpush.msra.mxu2 %v452_v9  ;;  %v551_v9 = vld [vmem:[#allocation9 + $0x748] sm:$0xff] }
  0xde   :  { %718 = vmatpush.msra.mxu1 %v435_v12  ;;  %758 = vmatpush.msra.mxu3 %v437_v14  ;;  %v534_v12 = vld [vmem:[#allocation9 + $0x6c0] sm:$0xff]  ;;  %v536_v14 = vld [vmem:[#allocation9 + $0x6d0] sm:$0xff] }
  0xdf   :  { %738 = vmatpush.msra.mxu2 %v436_v13  ;;  %v535_v13 = vld [vmem:[#allocation9 + $0x6c8] sm:$0xff] }
  0xe0   :  { %719 = vmatpush.msra.mxu1 %v419_v17  ;;  %v519_v17 = vld [vmem:[#allocation9 + $0x648] sm:$0xff] }
  0xe1   :  { %739 = vmatpush.msra.mxu2 %v420_v18  ;;  %v520_v18 = vld [vmem:[#allocation9 + $0x650] sm:$0xff] }
  0xe2   :  { %720 = vmatpush.msra.mxu1 %v403_v22  ;;  %v504_v22 = vld [vmem:[#allocation9 + $0x5d0] sm:$0xff] }
  0xe3   :  { %740 = vmatpush.msra.mxu2 %v404_v23  ;;  %v505_v23 = vld [vmem:[#allocation9 + $0x5d8] sm:$0xff] }
  0xe4   :  { %721 = vmatpush.msra.mxu1 %v387_v27  ;;  %v489_v27 = vld [vmem:[#allocation9 + $0x558] sm:$0xff] }
  0xe5   :  { %741 = vmatpush.msra.mxu2 %v388_v28  ;;  %v470_v28 = vld [vmem:[#allocation9 + $0x4c0] sm:$0xff] }
  0xe6   :  { %722 = vmatpush.msra.mxu1 %v371_v32  ;;  %v454_v32 = vld [vmem:[#allocation9 + $0x440] sm:$0xff] }
  0xe7   :  { %742 = vmatpush.msra.mxu2 %v372_v33  ;;  %v455_v33 = vld [vmem:[#allocation9 + $0x448] sm:$0xff] }
  0xe8   :  { %723 = vmatpush.msra.mxu1 %v355_v37  ;;  %v439_v37 = vld [vmem:[#allocation9 + $0x3c8] sm:$0xff] }
  0xe9   :  { %743 = vmatpush.msra.mxu2 %v356_v38  ;;  %v440_v38 = vld [vmem:[#allocation9 + $0x3d0] sm:$0xff] }
  0xea   :  { %724 = vmatpush.msra.mxu1 %v339_v42  ;;  %v424_v42 = vld [vmem:[#allocation9 + $0x350] sm:$0xff] }
  0xeb   :  { %744 = vmatpush.msra.mxu2 %v340_v43  ;;  %v425_v43 = vld [vmem:[#allocation9 + $0x358] sm:$0xff] }
  0xec   :  { %725 = vmatpush.msra.mxu1 %v323_v47  ;;  %v409_v47 = vld [vmem:[#allocation9 + $0x2d8] sm:$0xff] }
  0xed   :  { %745 = vmatpush.msra.mxu2 %v324_v48  ;;  %v390_v48 = vld [vmem:[#allocation9 + $0x240] sm:$0xff] }
 0x13d   :  { %v277_v16 = vpop.xlane.xlu0 %276 }
 0x13e   :  { %v1271_v20 = vadd.f32 %v279_v11, %v277_v16  ;;  %v434_v11 = vld [vmem:[#allocation9 + $0x3a0] sm:$0xff] }
 0x13f   :  { %698 = vmatpush.msra.mxu0 %v434_v11  ;;  %v418_v16 = vld [vmem:[#allocation9 + $0x320] sm:$0xff]  ;;  %v553_v11 = vld [vmem:[#allocation9 + $0x758] sm:$0xff] }
 0x140   :  { %v281_v25 = vrot.slane %v1271_v20, 4 }
 0x141   :  { %699 = vmatpush.msra.mxu0 %v418_v16  ;;  %v518_v16 = vld [vmem:[#allocation9 + $0x640] sm:$0xff] }
 0x142   :  { %v282_v30 = vmax.f32 %v1271_v20, %v281_v25  ;;  %v405_v25 = vld [vmem:[#allocation9 + $0x2b8] sm:$0xff] }
 0x143   :  { %700 = vmatpush.msra.mxu0 %v402_v21  ;;  %v503_v21 = vld [vmem:[#allocation9 + $0x5c8] sm:$0xff] }
 0x144   :  { %v283_v35 = vrot.slane %v282_v30, 2 }
 0x145   :  { %701 = vmatpush.msra.mxu0 %v386_v26  ;;  %v488_v26 = vld [vmem:[#allocation9 + $0x550] sm:$0xff] }
 0x146   :  { %v284_v41 = vmax.f32 %v282_v30, %v283_v35  ;;  %v389_v30 = vld [vmem:[#allocation9 + $0x238] sm:$0xff] }
 0x147   :  { %v373_v35 = vld [vmem:[#allocation9 + $0x1b8] sm:$0xff]  ;;  %702 = vmatpush.msra.mxu0 %v370_v31 }
 0x148   :  { %v285_v46 = vrot.slane %v284_v41, 1  ;;  %v473_v31 = vld [vmem:[#allocation9 + $0x4d8] sm:$0xff] }
 0x149   :  { %703 = vmatpush.msra.mxu0 %v354_v36  ;;  %v438_v36 = vld [vmem:[#allocation9 + $0x3c0] sm:$0xff] }
 0x14a   :  { %v286_v51 = vmax.f32 %v284_v41, %v285_v46  ;;  %v338_v41 = vld [vmem:[#allocation9 + $0xa0] sm:$0xff] }
 0x14b   :  { %704 = vmatpush.msra.mxu0 %v338_v41  ;;  %v322_v46 = vld [vmem:[#allocation9 + $0x20] sm:$0xff]  ;;  %v423_v41 = vld [vmem:[#allocation9 + $0x348] sm:$0xff] }
 0x14c   :  { %v287_v56 = vsub.f32 %v1271_v20, %v286_v51  ;;  %v421_v20 = vld [vmem:[#allocation9 + $0x338] sm:$0xff] }
 0x14d   :  { %759 = vmatpush.msra.mxu3 %v421_v20  ;;  %705 = vmatpush.msra.mxu0 %v322_v46  ;;  %v502_v20 = vld [vmem:[#allocation9 + $0x5c0] sm:$0xff]  ;;  %v408_v46 = vld [vmem:[#allocation9 + $0x2d0] sm:$0xff] }
 0x14e   :  { %v288_v61 = vmul.f32 1.442695, %v287_v56 }
 0x14f   :  { %760 = vmatpush.msra.mxu3 %v405_v25  ;;  %v487_v25 = vld [vmem:[#allocation9 + $0x548] sm:$0xff] }
 0x150   :  { %1038 = vpow2.f32 %v288_v61 }
 0x151   :  { %761 = vmatpush.msra.mxu3 %v389_v30  ;;  %v472_v30 = vld [vmem:[#allocation9 + $0x4d0] sm:$0xff] }
 0x153   :  { %762 = vmatpush.msra.mxu3 %v373_v35  ;;  %v457_v35 = vld [vmem:[#allocation9 + $0x458] sm:$0xff] }
 0x155   :  { %763 = vmatpush.msra.mxu3 %v357_v40  ;;  %v422_v40 = vld [vmem:[#allocation9 + $0x340] sm:$0xff] }
 0x156   :  { %v1276_v15 = vpop.eup %1038 }
 0x157   :  { %v290_v19 = vrot.slane %v1276_v15, 4  ;;  %764 = vmatpush.msra.mxu3 %v341_v45  ;;  %v407_v45 = vld [vmem:[#allocation9 + $0x2c8] sm:$0xff] }
 0x159   :  { %v291_v24 = vadd.f32 %v1276_v15, %v290_v19  ;;  %765 = vmatpush.msra.mxu3 %v325_v49  ;;  %v521_v19 = vld [vmem:[#allocation9 + $0x658] sm:$0xff]  ;;  %v391_v49 = vld [vmem:[#allocation9 + $0x248] sm:$0xff] }
 0x15b   :  { %v292_v29 = vrot.slane %v291_v24, 2 }
 0x15d   :  { %v293_v34 = vadd.f32 %v292_v29, %v291_v24  ;;  %v486_v24 = vld [vmem:[#allocation9 + $0x540] sm:$0xff]  ;;  %v471_v29 = vld [vmem:[#allocation9 + $0x4c8] sm:$0xff] }
 0x15f   :  { %v294_v39 = vrot.slane %v293_v34, 1 }
 0x161   :  { %v295_v44 = vadd.f32 %v294_v39, %v293_v34  ;;  %v456_v34 = vld [vmem:[#allocation9 + $0x450] sm:$0xff]  ;;  %v441_v39 = vld [vmem:[#allocation9 + $0x3d8] sm:$0xff] }
 0x163   :  { %1040 = vrcp.f32 %v295_v44  ;;  %v307_v53 = vand.u32 2147483648, %v295_v44  ;;  %v305_v55 = vand.u32 2147483647, %v295_v44  ;;  %vm301_vm1 = vweird.f32 %v295_v44 }
 0x165   :  { %v308_v57 = vor.u32 1.1754944e-38, %v307_v53  ;;  %vm306_vm3 = vcmp.eq.f32.partialorder %v305_v55, 8.507059e+37  ;;  %v375_v53 = vld [vmem:[#allocation9 + $0x1c8] sm:$0xff]  ;;  %v377_v55 = vld [vmem:[#allocation9 + $0x1d8] sm:$0xff] }
 0x169   :  { %v1041_v50 = vpop.eup %1040 }
 0x16a   :  { %v297_v51 = vmul.f32 %v1041_v50, %v295_v44  ;;  %vm302_vm0 = vweird.f32 %v1041_v50  ;;  %v406_v44 = vld [vmem:[#allocation9 + $0x2c0] sm:$0xff] }
 0x16b   :  { %vm303_vm2 = vmor %vm301_vm1, %vm302_vm0 }
 0x16c   :  { %v298_v52 = vsub.f32 1.0, %v297_v51  ;;  %v393_v51 = vld [vmem:[#allocation9 + $0x258] sm:$0xff] }
 0x16e   :  { %v299_v54 = vmul.f32 %v1041_v50, %v298_v52  ;;  %v374_v52 = vld [vmem:[#allocation9 + $0x1c0] sm:$0xff] }
 0x170   :  { %v300_v56 = vadd.f32 %v1041_v50, %v299_v54  ;;  %v376_v54 = vld [vmem:[#allocation9 + $0x1d0] sm:$0xff] }
 0x172   :  { %v304_v58 = vsel %vm303_vm2, %v1041_v50, %v300_v56  ;;  %v392_v50 = vld [vmem:[#allocation9 + $0x250] sm:$0xff]  ;;  %v358_v56 = vld [vmem:[#allocation9 + $0x140] sm:$0xff] }
 0x173   :  { %v309_v59 = vsel %vm306_vm3, %v308_v57, %v304_v58  ;;  %v359_v57 = vld [vmem:[#allocation9 + $0x148] sm:$0xff]  ;;  %v360_v58 = vld [vmem:[#allocation9 + $0x150] sm:$0xff] }
 0x174   :  { %v310_v60 = vmul.f32 %v1276_v15, %v309_v59  ;;  %v537_v15 = vld [vmem:[#allocation9 + $0x6d8] sm:$0xff] }
 0x175   :  { %v361_v59 = vld [vmem:[#allocation9 + $0x158] sm:$0xff] }
 0x176   :  { %v311_v61 = vmul.f32 %v310_v60, %v1259_v62  ;;  %v550_v62 = vld [vmem:[#allocation9 + $0x740] sm:$0xff] }
 0x177   :  { %v342_v60 = vld [vmem:[#allocation9 + $0xc0] sm:$0xff] }
 0x178   :  { %v312_v63 = vrot.slane %v311_v61, 4 }
 0x17a   :  { %v313_v0 = vadd.f32 %v312_v63, %v311_v61  ;;  %v343_v61 = vld [vmem:[#allocation9 + $0xc8] sm:$0xff]  ;;  %v344_v63 = vld [vmem:[#allocation9 + $0xd0] sm:$0xff] }
 0x17c   :  { %v314_v1 = vrot.slane %v313_v0, 2 }
 0x17e   :  { %v315_v2 = vadd.f32 %v314_v1, %v313_v0  ;;  %v345_v0 = vld [vmem:[#allocation9 + $0xd8] sm:$0xff]  ;;  %v326_v1 = vld [vmem:[#allocation9 + $0x40] sm:$0xff] }
 0x180   :  { %v316_v3 = vrot.slane %v315_v2, 1 }
 0x182   :  { %v1282_v4 = vadd.f32 %v316_v3, %v315_v2  ;;  %v327_v2 = vld [vmem:[#allocation9 + $0x48] sm:$0xff]  ;;  %v328_v3 = vld [vmem:[#allocation9 + $0x50] sm:$0xff] }
 0x184   :  { %626 = vmatmul.f32.vlgmr.msrb.gmra.mxu0 %v1282_v4  ;;  %646 = vmatmul.f32.vlgmr.msrb.gmra.mxu1 %v1282_v4 }
 0x185   :  { %666 = vmatmul.f32.vlgmr.msrb.gmra.mxu2 %v1282_v4  ;;  %686 = vmatmul.f32.vlgmr.msrb.gmra.mxu3 %v1282_v4 }
 0x186   :  { %770 = vmatpush.msrb.mxu0 %v566_v5  ;;  %790 = vmatpush.msrb.mxu1 %v567_v6  ;;  %v329_v5 = vld [vmem:[#allocation9 + $0x58] sm:$0xff]  ;;  %v570_v6 = vld [vmem:[#allocation9 + $0x7e0] sm:$0xff] }
 0x187   :  { %810 = vmatpush.msrb.mxu2 %v568_v7  ;;  %830 = vmatpush.msrb.mxu3 %v569_v8  ;;  %v571_v7 = vld [vmem:[#allocation9 + $0x7e8] sm:$0xff]  ;;  %v572_v8 = vld [vmem:[#allocation9 + $0x7f0] sm:$0xff] }
 0x188   :  { %771 = vmatpush.msrb.mxu0 %v550_v62  ;;  %791 = vmatpush.msrb.mxu1 %v551_v9  ;;  %v573_v62 = vld [vmem:[#allocation9 + $0x7f8] sm:$0xff]  ;;  %v554_v9 = vld [vmem:[#allocation9 + $0x760] sm:$0xff] }
 0x189   :  { %811 = vmatpush.msrb.mxu2 %v552_v10  ;;  %831 = vmatpush.msrb.mxu3 %v553_v11  ;;  %v555_v10 = vld [vmem:[#allocation9 + $0x768] sm:$0xff]  ;;  %v556_v11 = vld [vmem:[#allocation9 + $0x770] sm:$0xff] }
 0x18a   :  { %772 = vmatpush.msrb.mxu0 %v534_v12  ;;  %792 = vmatpush.msrb.mxu1 %v535_v13  ;;  %v557_v12 = vld [vmem:[#allocation9 + $0x778] sm:$0xff]  ;;  %v538_v13 = vld [vmem:[#allocation9 + $0x6e0] sm:$0xff] }
 0x18b   :  { %812 = vmatpush.msrb.mxu2 %v536_v14  ;;  %832 = vmatpush.msrb.mxu3 %v537_v15  ;;  %v539_v14 = vld [vmem:[#allocation9 + $0x6e8] sm:$0xff]  ;;  %v540_v15 = vld [vmem:[#allocation9 + $0x6f0] sm:$0xff] }
 0x18c   :  { %773 = vmatpush.msrb.mxu0 %v518_v16  ;;  %793 = vmatpush.msrb.mxu1 %v519_v17  ;;  %v541_v16 = vld [vmem:[#allocation9 + $0x6f8] sm:$0xff]  ;;  %v522_v17 = vld [vmem:[#allocation9 + $0x660] sm:$0xff] }
 0x18d   :  { %813 = vmatpush.msrb.mxu2 %v520_v18  ;;  %833 = vmatpush.msrb.mxu3 %v521_v19  ;;  %v523_v18 = vld [vmem:[#allocation9 + $0x668] sm:$0xff]  ;;  %v524_v19 = vld [vmem:[#allocation9 + $0x670] sm:$0xff] }
 0x18e   :  { %706 = vmatmul.f32.vlgmr.msra.gmra.mxu0 %v1282_v4  ;;  %726 = vmatmul.f32.vlgmr.msra.gmra.mxu1 %v1282_v4 }
 0x18f   :  { %746 = vmatmul.f32.vlgmr.msra.gmra.mxu2 %v1282_v4  ;;  %766 = vmatmul.f32.vlgmr.msra.gmra.mxu3 %v1282_v4 }
 0x190   :  { %774 = vmatpush.msrb.mxu0 %v502_v20  ;;  %794 = vmatpush.msrb.mxu1 %v503_v21  ;;  %v525_v20 = vld [vmem:[#allocation9 + $0x678] sm:$0xff]  ;;  %v506_v21 = vld [vmem:[#allocation9 + $0x5e0] sm:$0xff] }
 0x191   :  { %814 = vmatpush.msrb.mxu2 %v504_v22  ;;  %834 = vmatpush.msrb.mxu3 %v505_v23  ;;  %v507_v22 = vld [vmem:[#allocation9 + $0x5e8] sm:$0xff]  ;;  %v508_v23 = vld [vmem:[#allocation9 + $0x5f0] sm:$0xff] }
 0x192   :  { %775 = vmatpush.msrb.mxu0 %v486_v24  ;;  %795 = vmatpush.msrb.mxu1 %v487_v25  ;;  %v509_v24 = vld [vmem:[#allocation9 + $0x5f8] sm:$0xff]  ;;  %v490_v25 = vld [vmem:[#allocation9 + $0x560] sm:$0xff] }
 0x193   :  { %815 = vmatpush.msrb.mxu2 %v488_v26  ;;  %835 = vmatpush.msrb.mxu3 %v489_v27  ;;  %v491_v26 = vld [vmem:[#allocation9 + $0x568] sm:$0xff]  ;;  %v492_v27 = vld [vmem:[#allocation9 + $0x570] sm:$0xff] }
 0x194   :  { %776 = vmatpush.msrb.mxu0 %v470_v28  ;;  %796 = vmatpush.msrb.mxu1 %v471_v29  ;;  %v493_v28 = vld [vmem:[#allocation9 + $0x578] sm:$0xff]  ;;  %v474_v29 = vld [vmem:[#allocation9 + $0x4e0] sm:$0xff] }
 0x195   :  { %816 = vmatpush.msrb.mxu2 %v472_v30  ;;  %836 = vmatpush.msrb.mxu3 %v473_v31  ;;  %v475_v30 = vld [vmem:[#allocation9 + $0x4e8] sm:$0xff]  ;;  %v476_v31 = vld [vmem:[#allocation9 + $0x4f0] sm:$0xff] }
 0x196   :  { %777 = vmatpush.msrb.mxu0 %v454_v32  ;;  %797 = vmatpush.msrb.mxu1 %v455_v33  ;;  %v477_v32 = vld [vmem:[#allocation9 + $0x4f8] sm:$0xff]  ;;  %v458_v33 = vld [vmem:[#allocation9 + $0x460] sm:$0xff] }
 0x197   :  { %817 = vmatpush.msrb.mxu2 %v456_v34  ;;  %837 = vmatpush.msrb.mxu3 %v457_v35  ;;  %v459_v34 = vld [vmem:[#allocation9 + $0x468] sm:$0xff]  ;;  %v460_v35 = vld [vmem:[#allocation9 + $0x470] sm:$0xff] }
 0x198   :  { %778 = vmatpush.msrb.mxu0 %v438_v36  ;;  %798 = vmatpush.msrb.mxu1 %v439_v37  ;;  %v461_v36 = vld [vmem:[#allocation9 + $0x478] sm:$0xff]  ;;  %v442_v37 = vld [vmem:[#allocation9 + $0x3e0] sm:$0xff] }
 0x199   :  { %818 = vmatpush.msrb.mxu2 %v440_v38  ;;  %838 = vmatpush.msrb.mxu3 %v441_v39  ;;  %v443_v38 = vld [vmem:[#allocation9 + $0x3e8] sm:$0xff]  ;;  %v444_v39 = vld [vmem:[#allocation9 + $0x3f0] sm:$0xff] }
 0x19a   :  { %779 = vmatpush.msrb.mxu0 %v422_v40  ;;  %799 = vmatpush.msrb.mxu1 %v423_v41  ;;  %v445_v40 = vld [vmem:[#allocation9 + $0x3f8] sm:$0xff]  ;;  %v426_v41 = vld [vmem:[#allocation9 + $0x360] sm:$0xff] }
 0x19b   :  { %819 = vmatpush.msrb.mxu2 %v424_v42  ;;  %839 = vmatpush.msrb.mxu3 %v425_v43  ;;  %v427_v42 = vld [vmem:[#allocation9 + $0x368] sm:$0xff]  ;;  %v428_v43 = vld [vmem:[#allocation9 + $0x370] sm:$0xff] }
 0x19c   :  { %780 = vmatpush.msrb.mxu0 %v406_v44  ;;  %800 = vmatpush.msrb.mxu1 %v407_v45  ;;  %v429_v44 = vld [vmem:[#allocation9 + $0x378] sm:$0xff]  ;;  %v410_v45 = vld [vmem:[#allocation9 + $0x2e0] sm:$0xff] }
 0x19d   :  { %820 = vmatpush.msrb.mxu2 %v408_v46  ;;  %840 = vmatpush.msrb.mxu3 %v409_v47  ;;  %v411_v46 = vld [vmem:[#allocation9 + $0x2e8] sm:$0xff]  ;;  %v412_v47 = vld [vmem:[#allocation9 + $0x2f0] sm:$0xff] }
 0x19e   :  { %781 = vmatpush.msrb.mxu0 %v390_v48  ;;  %801 = vmatpush.msrb.mxu1 %v391_v49  ;;  %v413_v48 = vld [vmem:[#allocation9 + $0x2f8] sm:$0xff]  ;;  %v394_v49 = vld [vmem:[#allocation9 + $0x260] sm:$0xff] }
 0x19f   :  { %821 = vmatpush.msrb.mxu2 %v392_v50  ;;  %841 = vmatpush.msrb.mxu3 %v393_v51  ;;  %v395_v50 = vld [vmem:[#allocation9 + $0x268] sm:$0xff]  ;;  %v396_v51 = vld [vmem:[#allocation9 + $0x270] sm:$0xff] }
 0x1a0   :  { %782 = vmatpush.msrb.mxu0 %v374_v52  ;;  %802 = vmatpush.msrb.mxu1 %v375_v53  ;;  %v397_v52 = vld [vmem:[#allocation9 + $0x278] sm:$0xff]  ;;  %v378_v53 = vld [vmem:[#allocation9 + $0x1e0] sm:$0xff] }
 0x1a1   :  { %822 = vmatpush.msrb.mxu2 %v376_v54  ;;  %842 = vmatpush.msrb.mxu3 %v377_v55  ;;  %v379_v54 = vld [vmem:[#allocation9 + $0x1e8] sm:$0xff]  ;;  %v380_v55 = vld [vmem:[#allocation9 + $0x1f0] sm:$0xff] }
 0x1a2   :  { %783 = vmatpush.msrb.mxu0 %v358_v56  ;;  %803 = vmatpush.msrb.mxu1 %v359_v57  ;;  %v381_v56 = vld [vmem:[#allocation9 + $0x1f8] sm:$0xff]  ;;  %v362_v57 = vld [vmem:[#allocation9 + $0x160] sm:$0xff] }
 0x1a3   :  { %823 = vmatpush.msrb.mxu2 %v360_v58  ;;  %843 = vmatpush.msrb.mxu3 %v361_v59  ;;  %v363_v58 = vld [vmem:[#allocation9 + $0x168] sm:$0xff]  ;;  %v364_v59 = vld [vmem:[#allocation9 + $0x170] sm:$0xff] }
 0x1a4   :  { %784 = vmatpush.msrb.mxu0 %v342_v60  ;;  %804 = vmatpush.msrb.mxu1 %v343_v61  ;;  %v365_v60 = vld [vmem:[#allocation9 + $0x178] sm:$0xff]  ;;  %v346_v61 = vld [vmem:[#allocation9 + $0xe0] sm:$0xff] }
 0x1a5   :  { %824 = vmatpush.msrb.mxu2 %v344_v63  ;;  %844 = vmatpush.msrb.mxu3 %v345_v0  ;;  %v347_v63 = vld [vmem:[#allocation9 + $0xe8] sm:$0xff]  ;;  %v348_v0 = vld [vmem:[#allocation9 + $0xf0] sm:$0xff] }
 0x1a6   :  { %785 = vmatpush.msrb.mxu0 %v326_v1  ;;  %805 = vmatpush.msrb.mxu1 %v327_v2  ;;  %v349_v1 = vld [vmem:[#allocation9 + $0xf8] sm:$0xff]  ;;  %v330_v2 = vld [vmem:[#allocation9 + $0x60] sm:$0xff] }
 0x1a7   :  { %825 = vmatpush.msrb.mxu2 %v328_v3  ;;  %845 = vmatpush.msrb.mxu3 %v329_v5  ;;  %v331_v3 = vld [vmem:[#allocation9 + $0x68] sm:$0xff]  ;;  %v332_v5 = vld [vmem:[#allocation9 + $0x70] sm:$0xff] }
 0x1a8   :  { %786 = vmatmul.f32.vlgmr.msrb.gmra.mxu0 %v1282_v4  ;;  %806 = vmatmul.f32.vlgmr.msrb.gmra.mxu1 %v1282_v4 }
 0x1a9   :  { %826 = vmatmul.f32.vlgmr.msrb.gmra.mxu2 %v1282_v4  ;;  %846 = vmatmul.f32.vlgmr.msrb.gmra.mxu3 %v1282_v4 }
 0x1aa   :  { %850 = vmatpush.msra.mxu0 %v570_v6  ;;  %870 = vmatpush.msra.mxu1 %v571_v7  ;;  %v333_v6 = vld [vmem:[#allocation9 + $0x78] sm:$0xff] }
 0x1ab   :  { %890 = vmatpush.msra.mxu2 %v572_v8  ;;  %910 = vmatpush.msra.mxu3 %v573_v62  ;;  %v574_v62 = vld [vmem:[#allocation11] sm:$0xff] }
 0x1ac   :  { %851 = vmatpush.msra.mxu0 %v554_v9  ;;  %871 = vmatpush.msra.mxu1 %v555_v10  ;;  %v580_v9 = vperm.slane %v574_v62, 2  ;;  %v581_v10 = vperm.slane %v574_v62, 3 }
 0x1ad   :  { %891 = vmatpush.msra.mxu2 %v556_v11  ;;  %911 = vmatpush.msra.mxu3 %v557_v12  ;;  %v579_v11 = vperm.slane %v574_v62, 1 }
 0x1ae   :  { %852 = vmatpush.msra.mxu0 %v538_v13  ;;  %872 = vmatpush.msra.mxu1 %v539_v14  ;;  %v582_v14 = vperm.slane %v574_v62, 4 }
 0x1af   :  { %892 = vmatpush.msra.mxu2 %v540_v15  ;;  %912 = vmatpush.msra.mxu3 %v541_v16  ;;  %v583_v15 = vperm.slane %v574_v62, 5 }
 0x1b0   :  { %853 = vmatpush.msra.mxu0 %v522_v17  ;;  %873 = vmatpush.msra.mxu1 %v523_v18 }
 0x1b1   :  { %893 = vmatpush.msra.mxu2 %v524_v19  ;;  %913 = vmatpush.msra.mxu3 %v525_v20 }
 0x1b2   :  { %854 = vmatpush.msra.mxu0 %v506_v21  ;;  %874 = vmatpush.msra.mxu1 %v507_v22 }
 0x1b3   :  { %894 = vmatpush.msra.mxu2 %v508_v23  ;;  %914 = vmatpush.msra.mxu3 %v509_v24  ;;  %v578_v23 = vperm.slane %v574_v62, 0 }
 0x1b4   :  { %855 = vmatpush.msra.mxu0 %v490_v25  ;;  %875 = vmatpush.msra.mxu1 %v491_v26  ;;  %v584_v25 = vperm.slane %v574_v62, 6  ;;  %v585_v26 = vperm.slane %v574_v62, 7 }
 0x1b5   :  { %895 = vmatpush.msra.mxu2 %v492_v27  ;;  %915 = vmatpush.msra.mxu3 %v493_v28 }
 0x1b6   :  { %856 = vmatpush.msra.mxu0 %v474_v29  ;;  %876 = vmatpush.msra.mxu1 %v475_v30 }
 0x1b7   :  { %896 = vmatpush.msra.mxu2 %v476_v31  ;;  %916 = vmatpush.msra.mxu3 %v477_v32 }
 0x1b8   :  { %857 = vmatpush.msra.mxu0 %v458_v33  ;;  %877 = vmatpush.msra.mxu1 %v459_v34 }
 0x1b9   :  { %897 = vmatpush.msra.mxu2 %v460_v35  ;;  %917 = vmatpush.msra.mxu3 %v461_v36 }
 0x1ba   :  { %858 = vmatpush.msra.mxu0 %v442_v37  ;;  %878 = vmatpush.msra.mxu1 %v443_v38 }
 0x1bb   :  { %898 = vmatpush.msra.mxu2 %v444_v39  ;;  %918 = vmatpush.msra.mxu3 %v445_v40 }
 0x1bc   :  { %859 = vmatpush.msra.mxu0 %v426_v41  ;;  %879 = vmatpush.msra.mxu1 %v427_v42 }
 0x1bd   :  { %899 = vmatpush.msra.mxu2 %v428_v43  ;;  %919 = vmatpush.msra.mxu3 %v429_v44 }
 0x1be   :  { %860 = vmatpush.msra.mxu0 %v410_v45  ;;  %880 = vmatpush.msra.mxu1 %v411_v46 }
 0x1bf   :  { %900 = vmatpush.msra.mxu2 %v412_v47  ;;  %920 = vmatpush.msra.mxu3 %v413_v48 }
 0x1c0   :  { %861 = vmatpush.msra.mxu0 %v394_v49  ;;  %881 = vmatpush.msra.mxu1 %v395_v50 }
 0x1c1   :  { %901 = vmatpush.msra.mxu2 %v396_v51  ;;  %921 = vmatpush.msra.mxu3 %v397_v52 }
 0x1c2   :  { %862 = vmatpush.msra.mxu0 %v378_v53  ;;  %882 = vmatpush.msra.mxu1 %v379_v54  ;;  %v575_v54 = vld [vmem:[#allocation11 + $0x8] sm:$0xff] }
 0x1c3   :  { %902 = vmatpush.msra.mxu2 %v380_v55  ;;  %922 = vmatpush.msra.mxu3 %v381_v56  ;;  %v588_v55 = vperm.slane %v575_v54, 2  ;;  %v589_v56 = vperm.slane %v575_v54, 3 }
 0x1c4   :  { %863 = vmatpush.msra.mxu0 %v362_v57  ;;  %883 = vmatpush.msra.mxu1 %v363_v58  ;;  %v587_v57 = vperm.slane %v575_v54, 1 }
 0x1c5   :  { %903 = vmatpush.msra.mxu2 %v364_v59  ;;  %923 = vmatpush.msra.mxu3 %v365_v60  ;;  %v590_v60 = vperm.slane %v575_v54, 4 }
 0x1c6   :  { %864 = vmatpush.msra.mxu0 %v346_v61  ;;  %884 = vmatpush.msra.mxu1 %v347_v63  ;;  %v591_v61 = vperm.slane %v575_v54, 5 }
 0x1c7   :  { %904 = vmatpush.msra.mxu2 %v348_v0  ;;  %924 = vmatpush.msra.mxu3 %v349_v1 }
 0x1c8   :  { %865 = vmatpush.msra.mxu0 %v330_v2  ;;  %885 = vmatpush.msra.mxu1 %v331_v3 }
 0x1c9   :  { %905 = vmatpush.msra.mxu2 %v332_v5  ;;  %925 = vmatpush.msra.mxu3 %v333_v6 }
 0x1ca   :  { %866 = vmatmul.f32.vlgmr.msra.gmra.mxu0 %v1282_v4  ;;  %886 = vmatmul.f32.vlgmr.msra.gmra.mxu1 %v1282_v4 }
 0x1cb   :  { %906 = vmatmul.f32.vlgmr.msra.gmra.mxu2 %v1282_v4  ;;  %926 = vmatmul.f32.vlgmr.msra.gmra.mxu3 %v1282_v4 }
 0x201   :  { %v627_v7 = vpop.f32.mrf.mxu0  ;;  %v647_v8 = vpop.f32.mrf.mxu1 }
 0x202   :  { %v648_v20 = vadd.f32 %v647_v8, %v579_v11  ;;  %v628_v30 = vadd.f32 %v627_v7, %v578_v23  ;;  %v586_v7 = vperm.slane %v575_v54, 0 }
 0x204   :  { %v931_v27 = vmax.f32 %v648_v20, 0.0  ;;  %v930_v42 = vmax.f32 %v628_v30, 0.0 }
 0x206   :  { %v962_v37 = vrot.slane %v931_v27, 7 }
 0x208   :  { %v667_v12 = vpop.f32.mrf.mxu2  ;;  %v687_v13 = vpop.f32.mrf.mxu3  ;;  %v977_v46 = vsel %vm976_vm4, %v930_v42, %v962_v37 }
 0x209   :  { %v668_v16 = vadd.f32 %v667_v12, %v580_v9  ;;  %v688_v17 = vadd.f32 %v687_v13, %v581_v10  ;;  %v592_v9 = vperm.slane %v575_v54, 6  ;;  %v593_v10 = vperm.slane %v575_v54, 7 }
 0x20b   :  { %v707_v18 = vpop.f32.mrf.mxu0  ;;  %v727_v19 = vpop.f32.mrf.mxu1  ;;  %v932_v24 = vmax.f32 %v668_v16, 0.0  ;;  %v933_v4 = vmax.f32 %v688_v17, 0.0 }
 0x20c   :  { %v708_v21 = vadd.f32 %v707_v18, %v582_v14  ;;  %v728_v22 = vadd.f32 %v727_v19, %v583_v15 }
 0x20d   :  { %v963_v33 = vrot.slane %v932_v24, 6  ;;  %v964_v34 = vrot.slane %v933_v4, 5 }
 0x20e   :  { %v934_v28 = vmax.f32 %v708_v21, 0.0  ;;  %v935_v29 = vmax.f32 %v728_v22, 0.0 }
 0x20f   :  { %v979_v43 = vsel %vm978_vm5, %v963_v33, %v964_v34 }
 0x210   :  { %v965_v38 = vrot.slane %v934_v28, 4  ;;  %v966_v39 = vrot.slane %v935_v29, 3  ;;  %v981_v49 = vsel %vm980_vm6, %v977_v46, %v979_v43 }
 0x212   :  { %v747_v31 = vpop.f32.mrf.mxu2  ;;  %v767_v32 = vpop.f32.mrf.mxu3  ;;  %v983_v47 = vsel %vm982_vm7, %v965_v38, %v966_v39 }
 0x213   :  { %v748_v35 = vadd.f32 %v747_v31, %v584_v25  ;;  %v768_v36 = vadd.f32 %v767_v32, %v585_v26 }
 0x215   :  { %v936_v40 = vmax.f32 %v748_v35, 0.0  ;;  %v937_v41 = vmax.f32 %v768_v36, 0.0 }
 0x217   :  { %v967_v44 = vrot.slane %v936_v40, 2  ;;  %v968_v45 = vrot.slane %v937_v41, 1 }
 0x219   :  { %v985_v48 = vsel %vm984_vm8, %v967_v44, %v968_v45 }
 0x21a   :  { %v987_v50 = vsel %vm986_vm9, %v983_v47, %v985_v48 }
 0x21b   :  { %v989_v51 = vsel %vm988_vm10, %v981_v49, %v987_v50 }
 0x21c   :  { %999 = vst [vmem:[#allocation12] sm:$0xff] %v989_v51 }
 0x225   :  { %v787_v52 = vpop.f32.mrf.mxu0  ;;  %v807_v53 = vpop.f32.mrf.mxu1 }
 0x226   :  { %v808_v3 = vadd.f32 %v807_v53, %v587_v57  ;;  %v788_v14 = vadd.f32 %v787_v52, %v586_v7 }
 0x228   :  { %v939_v11 = vmax.f32 %v808_v3, 0.0  ;;  %v938_v25 = vmax.f32 %v788_v14, 0.0 }
 0x22a   :  { %v969_v21 = vrot.slane %v939_v11, 7 }
 0x22c   :  { %v827_v58 = vpop.f32.mrf.mxu2  ;;  %v847_v59 = vpop.f32.mrf.mxu3  ;;  %v990_v29 = vsel %vm976_vm4, %v938_v25, %v969_v21 }
 0x22d   :  { %v828_v63 = vadd.f32 %v827_v58, %v588_v55  ;;  %v848_v0 = vadd.f32 %v847_v59, %v589_v56 }
 0x22f   :  { %v940_v8 = vmax.f32 %v828_v63, 0.0  ;;  %v941_v62 = vmax.f32 %v848_v0, 0.0 }
 0x231   :  { %v970_v17 = vrot.slane %v940_v8, 6  ;;  %v971_v18 = vrot.slane %v941_v62, 5 }
 0x233   :  { %v991_v26 = vsel %vm978_vm5, %v970_v17, %v971_v18 }
 0x234   :  { %v992_v32 = vsel %vm980_vm6, %v990_v29, %v991_v26 }
 0x247   :  { %v867_v1 = vpop.f32.mrf.mxu0  ;;  %v887_v2 = vpop.f32.mrf.mxu1 }
 0x248   :  { %v868_v5 = vadd.f32 %v867_v1, %v590_v60  ;;  %v888_v6 = vadd.f32 %v887_v2, %v591_v61 }
 0x24a   :  { %v942_v12 = vmax.f32 %v868_v5, 0.0  ;;  %v943_v13 = vmax.f32 %v888_v6, 0.0 }
 0x24c   :  { %v972_v22 = vrot.slane %v942_v12, 4  ;;  %v973_v23 = vrot.slane %v943_v13, 3 }
 0x24e   :  { %v907_v15 = vpop.f32.mrf.mxu2  ;;  %v927_v16 = vpop.f32.mrf.mxu3  ;;  %v993_v30 = vsel %vm982_vm7, %v972_v22, %v973_v23 }
 0x24f   :  { %v908_v19 = vadd.f32 %v907_v15, %v592_v9  ;;  %v928_v20 = vadd.f32 %v927_v16, %v593_v10 }
 0x251   :  { %v944_v24 = vmax.f32 %v908_v19, 0.0  ;;  %v945_v4 = vmax.f32 %v928_v20, 0.0 }
 0x253   :  { %v974_v27 = vrot.slane %v944_v24, 2  ;;  %v975_v28 = vrot.slane %v945_v4, 1 }
 0x255   :  { %v994_v31 = vsel %vm984_vm8, %v974_v27, %v975_v28 }
 0x256   :  { %v995_v33 = vsel %vm986_vm9, %v993_v30, %v994_v31 }
 0x257   :  { %v996_v34 = vsel %vm988_vm10, %v992_v32, %v995_v33 }
 0x258   :  { %1000 = vst [vmem:[#allocation12 + $0x8] sm:$0xff] %v996_v34 }
 0x259   :  { %1011 = dma.vmem_to_hbm [thread:$0]  %s1007_s28, 256, %s1009_s8, [#allocation5]  }
 0x25a   :  { %1192 = dma.done.wait [#allocation5], 256  }
 0x25b   :  { %1193 = vsyncadd [#allocation5], 4294967040 }
 0x25c   :  { %1016 = vsyncpa [#allocation4], 1 }
 0x25d   :  { %1017 = vsyncpa [#allocation7], 1 }
 0x25e   :  { %1018 = vsyncpa [#allocation10], 1 }
 0x25f   :  { %1019 = vsyncpa [#allocation5], 1 }

</bundles_post_ra>
